<compile_context>
chip_gen: v7x
topology: tpu7x:2x2x1
jax: 0.10.0
libtpu: 0.0.40
codegen_flags: <defaults>
</compile_context>

<pallas_src>
import functools
from typing import NamedTuple

import jax
import jax.numpy as jnp
from jax.experimental import pallas as pl
from jax.experimental.pallas import tpu as pltpu  # noqa: F401  (kept for parity)

LEAKY_SLOPE = 0.01   # torch.nn.LeakyReLU default negative_slope
BN_EPS = 1e-5        # torch.nn.BatchNorm1d default eps
L2_EPS = 1e-12       # torch F.normalize default eps
LANE = 128


def _leaky_relu(x):
    # slope < 1  =>  leaky_relu(x) == max(x, slope * x); no compare+select.
    return jnp.maximum(x, LEAKY_SLOPE * x)


def _round_up(n, m):
    return ((n + m - 1) // m) * m


# ----------------------------- Pallas kernel --------------------------------

def _ramannet_kernel(x_ref, w_win_ref, w_sd_ref, w_em_ref, w_cl_ref, b_ref,
                     logits_ref, emb_ref, *, f_pad, n2_pad, emb_pad):
    """Fused RamanNet forward: 4 back-to-back MXU matmuls + L2 normalize."""
    # Packed bias slab: [window | summary_dense | embedding | classifier].
    # All slices are static and lane-aligned (every segment is a multiple of 128).
    b_win = b_ref[:, :f_pad]
    b_sd = b_ref[:, f_pad:f_pad + n2_pad]
    b_em = b_ref[:, f_pad + n2_pad:f_pad + n2_pad + emb_pad]
    b_cl = b_ref[:, f_pad + n2_pad + emb_pad:]

    # All per-window Linear+BN+LeakyReLU blocks + torch.cat(dim=1) as ONE matmul
    # against the block-structured fused weight (BN already folded in).
    feats = _leaky_relu(jnp.dot(x_ref[...], w_win_ref[...],
                                preferred_element_type=jnp.float32) + b_win)

    # summary_dense (+ folded BN + LeakyReLU); dropout1/dropouts are identity (eval).
    h = _leaky_relu(jnp.dot(feats, w_sd_ref[...],
                            preferred_element_type=jnp.float32) + b_sd)

    # embedding (+ folded BN + LeakyReLU)
    e = _leaky_relu(jnp.dot(h, w_em_ref[...],
                            preferred_element_type=jnp.float32) + b_em)

    # L2 normalize along dim=1 (torch F.normalize, p=2):
    # e / max(||e||, eps) == e * rsqrt(max(||e||^2, eps^2))   (rsqrt -> EUP slot).
    # Padded columns of e are exactly zero, so they do not perturb the norm.
    sumsq = jnp.sum(e * e, axis=1, keepdims=True)
    emb = e * jax.lax.rsqrt(jnp.maximum(sumsq, L2_EPS * L2_EPS))
    emb_ref[...] = emb

    # classifier — output columns zero-padded to 128 lanes (lane-dense store).
    logits_ref[...] = jnp.dot(emb, w_cl_ref[...],
                              preferred_element_type=jnp.float32) + b_cl


# --------------------------- One-time parameter prep -------------------------

def fold_bn(gamma, beta, mean, var):
    scale = gamma / jnp.sqrt(var + BN_EPS)
    shift = beta - mean * scale
    return scale, shift


def fold_bn_into_linear(w, b, gamma, beta, mean, var):
    """(w', b') s.t. leaky(x@w' + b') == leaky(BN(x@w + b)) in eval mode."""
    scale, shift = fold_bn(gamma, beta, mean, var)
    return w * scale, b * scale + shift


class PreparedRamanNet(NamedTuple):
    w_win: jax.Array    # (L, f_pad)   fused block-structured window weight
    w_sd: jax.Array     # (f_pad, n2_pad)
    w_em: jax.Array     # (n2_pad, emb_pad)
    w_cl: jax.Array     # (emb_pad, nc_pad)
    b_slab: jax.Array   # (1, f_pad + n2_pad + emb_pad + nc_pad)
    f_pad: int
    n2_pad: int
    emb_pad: int
    nc_pad: int
    emb_dim: int
    num_classes: int


def prepare_ramannet(params):
    """One-time prep (BN folding, window fusion, lane padding, bias packing).

    Runs OUTSIDE the per-forward path; the returned arrays are constants for
    inference, so none of this cost appears in the steady state.
    """
    nw, W, step = params.num_windows, params.window_size, params.step
    L = params.input_length
    n1 = params.wb_w.shape[-1]
    n2 = params.sd_w.shape[-1]
    emb_dim = params.em_w.shape[-1]
    nc = params.num_classes

    wb_w, wb_b = fold_bn_into_linear(params.wb_w, params.wb_b,
                                     params.wb_gamma, params.wb_beta,
                                     params.wb_mean, params.wb_var)
    sd_w, sd_b = fold_bn_into_linear(params.sd_w, params.sd_b,
                                     params.sd_gamma, params.sd_beta,
                                     params.sd_mean, params.sd_var)
    em_w, em_b = fold_bn_into_linear(params.em_w, params.em_b,
                                     params.em_gamma, params.em_beta,
                                     params.em_mean, params.em_var)

    F = nw * n1
    f_pad = _round_up(F, LANE)
    n2_pad = _round_up(n2, LANE)
    emb_pad = _round_up(emb_dim, LANE)
    nc_pad = _round_up(nc, LANE)

    # Fused block-structured window weight: overlapping windows share input
    # rows but occupy disjoint column blocks (scatter, not sum).
    w_win = jnp.zeros((L, f_pad), jnp.float32)
    for i in range(nw):
        w_win = w_win.at[i * step:i * step + W, i * n1:(i + 1) * n1].set(wb_w[i])
    b_win = jnp.pad(wb_b.reshape(1, F), ((0, 0), (0, f_pad - F)))

    # Zero-pad everything to lane-dense widths; padding is inert because the
    # corresponding weight rows/cols and biases are zero and leaky(0) == 0.
    w_sd = jnp.pad(sd_w, ((0, f_pad - F), (0, n2_pad - n2)))
    b_sd = jnp.pad(sd_b, ((0, 0), (0, n2_pad - n2)))
    w_em = jnp.pad(em_w, ((0, n2_pad - n2), (0, emb_pad - emb_dim)))
    b_em = jnp.pad(em_b, ((0, 0), (0, emb_pad - emb_dim)))
    w_cl = jnp.pad(params.cl_w, ((0, emb_pad - emb_dim), (0, nc_pad - nc)))
    b_cl = jnp.pad(params.cl_b, ((0, 0), (0, nc_pad - nc)))

    b_slab = jnp.concatenate([b_win, b_sd, b_em, b_cl], axis=1)

    return PreparedRamanNet(w_win=w_win, w_sd=w_sd, w_em=w_em, w_cl=w_cl,
                            b_slab=b_slab, f_pad=f_pad, n2_pad=n2_pad,
                            emb_pad=emb_pad, nc_pad=nc_pad,
                            emb_dim=emb_dim, num_classes=nc)


# ------------------------------ Forward (steady state) -----------------------

def ramannet_forward(prep: PreparedRamanNet, x):
    """Pallas-backed forward. x: (B, input_length) f32. Returns (out, emb)."""
    B = x.shape[0]
    kernel = functools.partial(_ramannet_kernel,
                               f_pad=prep.f_pad,
                               n2_pad=prep.n2_pad,
                               emb_pad=prep.emb_pad)
    # Whole model fits trivially in VMEM (<1 MB of params): single grid step,
    # no BlockSpecs, 6 inputs / 2 outputs.
    # TODO(synk): if B / input_length grow, add a batch grid axis tiled in
    # multiples of 8 rows with dimension_semantics=("parallel",) so both v7x
    # TensorCores are used, and budget tiles against v7x's 32 MiB scoped VMEM.
    logits_pad, emb_pad_arr = pl.pallas_call(
        kernel,
        out_shape=(jax.ShapeDtypeStruct((B, prep.nc_pad), jnp.float32),
                   jax.ShapeDtypeStruct((B, prep.emb_pad), jnp.float32)),
    )(x, prep.w_win, prep.w_sd, prep.w_em, prep.w_cl, prep.b_slab)
    return logits_pad[:, :prep.num_classes], emb_pad_arr[:, :prep.emb_dim]


# ------------------------------ Params / reference ---------------------------

class RamanNetParams:
    def __init__(self, key, input_length, window_size, step, n1, n2,
                 embedding_dim, num_classes):
        self.input_length = input_length
        self.window_size = window_size
        self.step = step
        self.num_windows = (input_length - window_size) // step + 1
        self.num_classes = num_classes
        nw = self.num_windows

        ks = jax.random.split(key, 16)

        def rnd(k, shape, s=0.1):
            return jax.random.normal(k, shape, dtype=jnp.float32) * s

        # per-window blocks: Linear(window_size, n1) + BN(n1)
        self.wb_w = rnd(ks[0], (nw, window_size, n1))
        self.wb_b = rnd(ks[1], (nw, 1, n1))
        self.wb_gamma = 1.0 + rnd(ks[2], (nw, 1, n1))
        self.wb_beta = rnd(ks[3], (nw, 1, n1))
        self.wb_mean = rnd(ks[4], (nw, 1, n1))
        self.wb_var = 0.5 + jnp.abs(rnd(ks[5], (nw, 1, n1)))

        # summary_dense: Linear(n1*nw, n2) + BN(n2)
        F = n1 * nw
        self.sd_w = rnd(ks[6], (F, n2))
        self.sd_b = rnd(ks[7], (1, n2))
        self.sd_gamma = 1.0 + rnd(ks[8], (1, n2))
        self.sd_beta = rnd(ks[9], (1, n2))
        self.sd_mean = rnd(ks[10], (1, n2))
        self.sd_var = 0.5 + jnp.abs(rnd(ks[11], (1, n2)))

        # embedding: Linear(n2, embedding_dim) + BN(embedding_dim)
        self.em_w = rnd(ks[12], (n2, embedding_dim))
        self.em_b = rnd(ks[13], (1, embedding_dim))
        kg = jax.random.split(ks[14], 4)
        self.em_gamma = 1.0 + rnd(kg[0], (1, embedding_dim))
        self.em_beta = rnd(kg[1], (1, embedding_dim))
        self.em_mean = rnd(kg[2], (1, embedding_dim))
        self.em_var = 0.5 + jnp.abs(rnd(kg[3], (1, embedding_dim)))

        # classifier
        kc = jax.random.split(ks[15], 2)
        self.cl_w = rnd(kc[0], (embedding_dim, num_classes))
        self.cl_b = rnd(kc[1], (1, num_classes))


def ramannet_reference(params, x):
    """Pure-JAX reference (un-fused windows, un-folded BN) for correctness."""
    nw, W, step = params.num_windows, params.window_size, params.step
    wb_scale, wb_shift = fold_bn(params.wb_gamma, params.wb_beta,
                                 params.wb_mean, params.wb_var)
    leaky = lambda v: jnp.where(v > 0, v, LEAKY_SLOPE * v)
    outs = []
    for i in range(nw):
        xi = x[:, i * step: i * step + W]
        h = xi @ params.wb_w[i] + params.wb_b[i]
        h = h * wb_scale[i] + wb_shift[i]
        outs.append(leaky(h))
    feats = jnp.concatenate(outs, axis=1)

    s1, t1 = fold_bn(params.sd_gamma, params.sd_beta,
                     params.sd_mean, params.sd_var)
    s2, t2 = fold_bn(params.em_gamma, params.em_beta,
                     params.em_mean, params.em_var)
    h = leaky((feats @ params.sd_w + params.sd_b) * s1 + t1)
    e = leaky((h @ params.em_w + params.em_b) * s2 + t2)
    emb = e / jnp.maximum(jnp.sqrt(jnp.sum(e * e, axis=1, keepdims=True)),
                          L2_EPS)
    out = emb @ params.cl_w + params.cl_b
    return out, emb


if __name__ == "__main__":
    # Small shapes consistent with the module's forward.
    B = 8
    input_length = 100
    window_size = 50
    step = 25
    n1 = 32
    n2 = 64
    embedding_dim = 128   # module default; keeps the embedding store lane-dense
    num_classes = 2

    key = jax.random.PRNGKey(0)
    k_param, k_x = jax.random.split(key)
    params = RamanNetParams(k_param, input_length, window_size, step,
                            n1, n2, embedding_dim, num_classes)
    x = jax.random.normal(k_x, (B, input_length), dtype=jnp.float32)

    # One-time prep (out of the steady-state forward path).
    prep = prepare_ramannet(params)
    prep = jax.tree_util.tree_map(
        lambda a: jax.block_until_ready(a) if isinstance(a, jax.Array) else a, prep)

    out, emb = ramannet_forward(prep, x)
    out = jax.block_until_ready(out)
    emb = jax.block_until_ready(emb)

    out_ref, emb_ref = ramannet_reference(params, x)

    assert out.shape == (B, num_classes)
    assert emb.shape == (B, embedding_dim)
    assert jnp.allclose(out, out_ref, atol=1e-4, rtol=1e-4), \
        f"logits mismatch: {jnp.max(jnp.abs(out - out_ref))}"
    assert jnp.allclose(emb, emb_ref, atol=1e-4, rtol=1e-4), \
        f"embedding mismatch: {jnp.max(jnp.abs(emb - emb_ref))}"

    print("KERNEL_OK")
</pallas_src>

<mosaic_0001>
module attributes {stable_mosaic.version = 11 : i64} {
  func.func @_ramannet_kernel(%arg0: memref<8x100xf32, #tpu.memory_space<vmem>>, %arg1: memref<100x128xf32, #tpu.memory_space<vmem>>, %arg2: memref<128x128xf32, #tpu.memory_space<vmem>>, %arg3: memref<128x128xf32, #tpu.memory_space<vmem>>, %arg4: memref<128x128xf32, #tpu.memory_space<vmem>>, %arg5: memref<1x512xf32, #tpu.memory_space<vmem>>, %arg6: memref<8x128xf32, #tpu.memory_space<vmem>>, %arg7: memref<8x128xf32, #tpu.memory_space<vmem>>) attributes {dimension_semantics = [], scalar_prefetch = 0 : i64, scratch_operands = 0 : i64, tpu.core_type = #tpu.core_type<tc>} {
    %c0 = arith.constant 0 : index
    %c0_0 = arith.constant 0 : index
    %0 = vector.load %arg5[%c0, %c0_0] : memref<1x512xf32, #tpu.memory_space<vmem>>, vector<1x128xf32>
    %c0_1 = arith.constant 0 : index
    %c128 = arith.constant 128 : index
    %1 = vector.load %arg5[%c0_1, %c128] : memref<1x512xf32, #tpu.memory_space<vmem>>, vector<1x128xf32>
    %c0_2 = arith.constant 0 : index
    %c256 = arith.constant 256 : index
    %2 = vector.load %arg5[%c0_2, %c256] : memref<1x512xf32, #tpu.memory_space<vmem>>, vector<1x128xf32>
    %c0_3 = arith.constant 0 : index
    %c384 = arith.constant 384 : index
    %3 = vector.load %arg5[%c0_3, %c384] : memref<1x512xf32, #tpu.memory_space<vmem>>, vector<1x128xf32>
    %c0_4 = arith.constant 0 : index
    %c0_5 = arith.constant 0 : index
    %4 = vector.load %arg0[%c0_4, %c0_5] : memref<8x100xf32, #tpu.memory_space<vmem>>, vector<8x100xf32>
    %c0_6 = arith.constant 0 : index
    %c0_7 = arith.constant 0 : index
    %5 = vector.load %arg1[%c0_6, %c0_7] : memref<100x128xf32, #tpu.memory_space<vmem>>, vector<100x128xf32>
    %cst = arith.constant dense<0.000000e+00> : vector<8x128xf32>
    %6 = tpu.matmul %4, %5, %cst {dimension_numbers = #tpu.dot_dimension_numbers<[1], [0], [0], [1], [0, 0, 1, 1], [], []>} : vector<8x100xf32>, vector<100x128xf32>, vector<8x128xf32> -> vector<8x128xf32>
    %7 = vector.broadcast %0 : vector<1x128xf32> to vector<8x128xf32>
    %8 = arith.addf %6, %7 : vector<8x128xf32>
    %cst_8 = arith.constant 0.00999999977 : f32
    %9 = vector.broadcast %cst_8 : f32 to vector<8x128xf32>
    %10 = arith.mulf %9, %8 : vector<8x128xf32>
    %11 = arith.maximumf %8, %10 : vector<8x128xf32>
    %c0_9 = arith.constant 0 : index
    %c0_10 = arith.constant 0 : index
    %12 = vector.load %arg2[%c0_9, %c0_10] : memref<128x128xf32, #tpu.memory_space<vmem>>, vector<128x128xf32>
    %cst_11 = arith.constant dense<0.000000e+00> : vector<8x128xf32>
    %13 = tpu.matmul %11, %12, %cst_11 {dimension_numbers = #tpu.dot_dimension_numbers<[1], [0], [0], [1], [0, 0, 1, 1], [], []>} : vector<8x128xf32>, vector<128x128xf32>, vector<8x128xf32> -> vector<8x128xf32>
    %14 = vector.broadcast %1 : vector<1x128xf32> to vector<8x128xf32>
    %15 = arith.addf %13, %14 : vector<8x128xf32>
    %cst_12 = arith.constant 0.00999999977 : f32
    %16 = vector.broadcast %cst_12 : f32 to vector<8x128xf32>
    %17 = arith.mulf %16, %15 : vector<8x128xf32>
    %18 = arith.maximumf %15, %17 : vector<8x128xf32>
    %c0_13 = arith.constant 0 : index
    %c0_14 = arith.constant 0 : index
    %19 = vector.load %arg3[%c0_13, %c0_14] : memref<128x128xf32, #tpu.memory_space<vmem>>, vector<128x128xf32>
    %cst_15 = arith.constant dense<0.000000e+00> : vector<8x128xf32>
    %20 = tpu.matmul %18, %19, %cst_15 {dimension_numbers = #tpu.dot_dimension_numbers<[1], [0], [0], [1], [0, 0, 1, 1], [], []>} : vector<8x128xf32>, vector<128x128xf32>, vector<8x128xf32> -> vector<8x128xf32>
    %21 = vector.broadcast %2 : vector<1x128xf32> to vector<8x128xf32>
    %22 = arith.addf %20, %21 : vector<8x128xf32>
    %cst_16 = arith.constant 0.00999999977 : f32
    %23 = vector.broadcast %cst_16 : f32 to vector<8x128xf32>
    %24 = arith.mulf %23, %22 : vector<8x128xf32>
    %25 = arith.maximumf %22, %24 : vector<8x128xf32>
    %26 = arith.mulf %25, %25 : vector<8x128xf32>
    %cst_17 = arith.constant dense<0.000000e+00> : vector<8xf32>
    %27 = vector.multi_reduction <add>, %26, %cst_17 [1] : vector<8x128xf32> to vector<8xf32>
    %28 = vector.shape_cast %27 : vector<8xf32> to vector<8x1xf32>
    %cst_18 = arith.constant 1.000000e-24 : f32
    %29 = vector.broadcast %cst_18 : f32 to vector<8x1xf32>
    %30 = arith.maximumf %28, %29 : vector<8x1xf32>
    %31 = math.rsqrt %30 : vector<8x1xf32>
    %32 = vector.broadcast %31 : vector<8x1xf32> to vector<8x128xf32>
    %33 = arith.mulf %25, %32 : vector<8x128xf32>
    %c0_19 = arith.constant 0 : index
    %c0_20 = arith.constant 0 : index
    %34 = vector.load %arg7[%c0_19, %c0_20] : memref<8x128xf32, #tpu.memory_space<vmem>>, vector<8x128xf32>
    tpu.vector_store %arg7[%c0_19, %c0_20], %33 {strides = array<i32>} : memref<8x128xf32, #tpu.memory_space<vmem>>, vector<8x128xf32>,
    %c0_21 = arith.constant 0 : index
    %c0_22 = arith.constant 0 : index
    %35 = vector.load %arg4[%c0_21, %c0_22] : memref<128x128xf32, #tpu.memory_space<vmem>>, vector<128x128xf32>
    %cst_23 = arith.constant dense<0.000000e+00> : vector<8x128xf32>
    %36 = tpu.matmul %33, %35, %cst_23 {dimension_numbers = #tpu.dot_dimension_numbers<[1], [0], [0], [1], [0, 0, 1, 1], [], []>} : vector<8x128xf32>, vector<128x128xf32>, vector<8x128xf32> -> vector<8x128xf32>
    %37 = vector.broadcast %3 : vector<1x128xf32> to vector<8x128xf32>
    %38 = arith.addf %36, %37 : vector<8x128xf32>
    %c0_24 = arith.constant 0 : index
    %c0_25 = arith.constant 0 : index
    %39 = vector.load %arg6[%c0_24, %c0_25] : memref<8x128xf32, #tpu.memory_space<vmem>>, vector<8x128xf32>
    tpu.vector_store %arg6[%c0_24, %c0_25], %38 {strides = array<i32>} : memref<8x128xf32, #tpu.memory_space<vmem>>, vector<8x128xf32>,
    return
  }
}

</mosaic_0001>

<bundles_post_ra>
// kernel: tpu_custom_call.1
= control target key start
LH: loop header
LB: loop body
LE: loop exit
PB: predicated region body
PF: predicated region fallthrough
CT: control target
= control target key end

     0   :  { %13 = vsyncpa [#allocation3], 0  ;;  %s1188_s0 = inlined_call_operand.hbm [shape: f32[8,100], index: 0, kind: input, shape index: {}]   ;;  %s1189_s1 = inlined_call_operand.hbm [shape: f32[100,128], index: 1, kind: input, shape index: {}]   ;;  %s1190_s2 = inlined_call_operand.hbm [shape: f32[128,128], index: 2, kind: input, shape index: {}]   ;;  %s1191_s3 = inlined_call_operand.hbm [shape: f32[128,128], index: 3, kind: input, shape index: {}]   ;;  %s1192_s4 = inlined_call_operand.hbm [shape: f32[128,128], index: 4, kind: input, shape index: {}]   ;;  %s1193_s5 = inlined_call_operand.vmem [shape: f32[1,512], index: 5, kind: input, shape index: {}]   ;;  %s1194_s6 = inlined_call_operand.hbm [shape: f32[8,128], index: 6, kind: output, shape index: {0}]   ;;  %s1195_s7 = inlined_call_operand.hbm [shape: f32[8,128], index: 7, kind: output, shape index: {1}]  }
   0x1   :  { %14 = vsyncpa [#allocation6], 0 }
   0x2   :  { %15 = vsyncpa [#allocation9], 0 }
   0x3   :  { %16 = vsyncpa [#allocation4], 0 }
   0x4   :  { %17 = vsyncpa [#allocation13], 0  ;;  %s989_s24 = smov [#allocation5]   ;;  %s825_s28 = scalar_lea.hbm %s1189_s1, 1664 }
   0x5   :  { %s33_s25 = sshll.u32 %s989_s24, 4  ;;  %p826_p0 = scmp.ne.s32.totalorder %s1189_s1, %s825_s28  ;;  %s34_s25 = int_to_ptr.vmem [resolvable:$true] %s33_s25 }
   0x6   :  { %p829_p1 = scmp.lt.u32.totalorder %s825_s28, %s1189_s1 }
   0x8   :  { %p831_p2 = pnand %p829_p1, %p826_p0 }
   0xa   :  { %834 = shalt.err (!%p831_p2)
}
   0xb   :  { %s835_s10 = scalar_lea.vmem %s34_s25, 1664  ;;  %p840_p4 = scmp.lt.s32.totalorder %s34_s25, %s34_s25 }
   0xc   :  { %p836_p3 = scmp.ne.s32.totalorder %s34_s25, %s835_s10  ;;  %p841_p5 = scmp.lt.s32.totalorder %s835_s10, %s835_s10 }
   0xe   :  { %p842_p6 = por %p841_p5, %p840_p4 }
  0x10   :  { %p843_p7 = pnand %p842_p6, %p836_p3 }
  0x12   :  { %846 = shalt.err (!%p843_p7)
}
  0x13   :  { %s990_s11 = smov 128   ;;  %s991_s12 = smov 8  }
  0x14   :  { %39 = dma.hbm_to_vmem [thread:$0]  %s1189_s1, 1664, %s34_s25, [#allocation6], %s990_s11, %s990_s11, %s991_s12  }
  0x15   :  { %s992_s15 = smov [#allocation8]   ;;  %s993_s17 = smov [#allocation2]  }
  0x16   :  { %s57_s16 = sshll.u32 %s992_s15, 4  ;;  %s24_s18 = sshll.u32 %s993_s17, 4  ;;  %s58_s16 = int_to_ptr.vmem [resolvable:$true] %s57_s16  ;;  %s25_s18 = int_to_ptr.vmem [resolvable:$true] %s24_s18 }
  0x17   :  { %s847_s21 = scalar_lea.hbm %s1191_s3, 2048 }
  0x18   :  { %p848_p8 = scmp.ne.s32.totalorder %s1191_s3, %s847_s21  ;;  %p851_p9 = scmp.lt.u32.totalorder %s847_s21, %s1191_s3 }
  0x1a   :  { %p853_p10 = pnand %p851_p9, %p848_p8 }
  0x1c   :  { %856 = shalt.err (!%p853_p10)
}
  0x1d   :  { %s857_s1 = scalar_lea.vmem %s58_s16, 2048  ;;  %p862_p12 = scmp.lt.s32.totalorder %s58_s16, %s58_s16 }
  0x1e   :  { %p858_p11 = scmp.ne.s32.totalorder %s58_s16, %s857_s1  ;;  %p863_p13 = scmp.lt.s32.totalorder %s857_s1, %s857_s1 }
  0x20   :  { %p864_p0 = por %p863_p13, %p862_p12 }
  0x22   :  { %p865_p1 = pnand %p864_p0, %p858_p11 }
  0x24   :  { %868 = shalt.err (!%p865_p1)
}
  0x25   :  { %63 = dma.hbm_to_vmem [thread:$0]  %s1191_s3, 2048, %s58_s16, [#allocation9], %s990_s11, %s990_s11, %s991_s12  }
  0x26   :  { %s869_s30 = scalar_lea.hbm %s1188_s0, 128 }
  0x27   :  { %p870_p2 = scmp.ne.s32.totalorder %s1188_s0, %s869_s30  ;;  %p873_p3 = scmp.lt.u32.totalorder %s869_s30, %s1188_s0 }
  0x29   :  { %p875_p4 = pnand %p873_p3, %p870_p2 }
  0x2b   :  { %878 = shalt.err (!%p875_p4)
}
  0x2c   :  { %s879_s14 = scalar_lea.vmem %s25_s18, 128  ;;  %p884_p6 = scmp.lt.s32.totalorder %s25_s18, %s25_s18 }
  0x2d   :  { %p880_p5 = scmp.ne.s32.totalorder %s25_s18, %s879_s14  ;;  %p885_p7 = scmp.lt.s32.totalorder %s879_s14, %s879_s14 }
  0x2f   :  { %p886_p8 = por %p885_p7, %p884_p6 }
  0x31   :  { %p887_p9 = pnand %p886_p8, %p880_p5 }
  0x33   :  { %890 = shalt.err (!%p887_p9)
}
  0x34   :  { %27 = dma.hbm_to_vmem [thread:$0]  %s1188_s0, 128, %s25_s18, [#allocation3]  }
  0x35   :  { %s994_s16 = smov [#allocation7]   ;;  %s995_s19 = smov [#allocation10]  }
  0x36   :  { %s45_s17 = sshll.u32 %s994_s16, 4  ;;  %s69_s20 = sshll.u32 %s995_s19, 4  ;;  %s46_s17 = int_to_ptr.vmem [resolvable:$true] %s45_s17  ;;  %s70_s20 = int_to_ptr.vmem [resolvable:$true] %s69_s20 }
  0x37   :  { %s891_s23 = scalar_lea.hbm %s1190_s2, 2048 }
  0x38   :  { %p892_p10 = scmp.ne.s32.totalorder %s1190_s2, %s891_s23  ;;  %p895_p11 = scmp.lt.u32.totalorder %s891_s23, %s1190_s2 }
  0x3a   :  { %p897_p12 = pnand %p895_p11, %p892_p10 }
  0x3c   :  { %900 = shalt.err (!%p897_p12)
}
  0x3d   :  { %s901_s0 = scalar_lea.vmem %s46_s17, 2048  ;;  %p906_p0 = scmp.lt.s32.totalorder %s46_s17, %s46_s17 }
  0x3e   :  { %p902_p13 = scmp.ne.s32.totalorder %s46_s17, %s901_s0  ;;  %p907_p1 = scmp.lt.s32.totalorder %s901_s0, %s901_s0 }
  0x40   :  { %p908_p2 = por %p907_p1, %p906_p0 }
  0x42   :  { %p909_p3 = pnand %p908_p2, %p902_p13 }
  0x44   :  { %912 = shalt.err (!%p909_p3)
}
  0x45   :  { %51 = dma.hbm_to_vmem [thread:$0]  %s1190_s2, 2048, %s46_s17, [#allocation6], %s990_s11, %s990_s11, %s991_s12  }
  0x46   :  { %s913_s30 = scalar_lea.hbm %s1192_s4, 2048 }
  0x47   :  { %p914_p4 = scmp.ne.s32.totalorder %s1192_s4, %s913_s30  ;;  %p917_p5 = scmp.lt.u32.totalorder %s913_s30, %s1192_s4 }
  0x49   :  { %p919_p6 = pnand %p917_p5, %p914_p4 }
  0x4b   :  { %922 = shalt.err (!%p919_p6)
}
  0x4c   :  { %s923_s14 = scalar_lea.vmem %s70_s20, 2048  ;;  %p928_p8 = scmp.lt.s32.totalorder %s70_s20, %s70_s20 }
  0x4d   :  { %p924_p7 = scmp.ne.s32.totalorder %s70_s20, %s923_s14  ;;  %p929_p9 = scmp.lt.s32.totalorder %s923_s14, %s923_s14 }
  0x4f   :  { %p930_p10 = por %p929_p9, %p928_p8 }
  0x51   :  { %p931_p11 = pnand %p930_p10, %p924_p7 }
  0x53   :  { %934 = shalt.err (!%p931_p11)
}
  0x54   :  { %75 = dma.hbm_to_vmem [thread:$0]  %s1192_s4, 2048, %s70_s20, [#allocation9], %s990_s11, %s990_s11, %s991_s12  }
  0x55   :  { %979 = dma.done.wait [#allocation3], 128  }
  0x56   :  { %980 = vsyncadd [#allocation3], 4294967168 }
  0x57   :  { %981 = dma.done.wait [#allocation6], 3712  }
  0x58   :  { %982 = vsyncadd [#allocation6], 4294963584 }
  0x59   :  { %983 = dma.done.wait [#allocation9], 4096  }
  0x5a   :  { %984 = vsyncadd [#allocation9], 4294963200  ;;  %v996_v0 = vmov 0.0|0.0   ;;  %vm997_vm0 = vmmov 0   ;;  %v998_v1 = vmov 0.0   ;;  %v98_v2 = vld [vmem:[#allocation5] sm:$0xff] }
  0x5b   :  { %721 = vmatprep.subr.bf16.mxu0 %v996_v0  ;;  %613 = vmatprep.mubr.msk.f32.mxu0 %vm997_vm0, %v998_v1  ;;  %v99_v3 = vld [vmem:[#allocation5 + $0x8] sm:$0xff]  ;;  %v100_v4 = vld [vmem:[#allocation5 + $0x10] sm:$0xff]  ;;  %v101_v6 = vld [vmem:[#allocation5 + $0x18] sm:$0xff]  ;;  %vm121_vm1 = vcmask 1043456   ;;  %vm117_vm2 = vcmask 818176   ;;  %s999_s19 = smov [#allocation12]  }
  0x5c   :  { %739 = vmatprep.subr.bf16.mxu1 %v996_v0  ;;  %648 = vmatprep.mubr.msk.f32.mxu1 %vm997_vm0, %v998_v1  ;;  %v722_v5 = vpack.c.bf16 %v99_v3, %v98_v2  ;;  %v725_v7 = vpack.c.bf16 %v101_v6, %v100_v4  ;;  %v102_v8 = vld [vmem:[#allocation5 + $0x20] sm:$0xff]  ;;  %v103_v9 = vld [vmem:[#allocation5 + $0x28] sm:$0xff]  ;;  %v198_v11 = vld [vmem:[#allocation7 + $0x8] sm:$0xff]  ;;  %s501_s20 = sshll.u32 %s999_s19, 4  ;;  %s502_s20 = int_to_ptr.vmem [resolvable:$true] %s501_s20 }
  0x5d   :  { %v197_v10 = vld [vmem:[#allocation7] sm:$0xff]  ;;  %v199_v12 = vld [vmem:[#allocation7 + $0x10] sm:$0xff]  ;;  %v200_v13 = vld [vmem:[#allocation7 + $0x18] sm:$0xff]  ;;  %v728_v15 = vpack.c.bf16 %v103_v9, %v102_v8  ;;  %s935_s21 = scalar_lea.vmem %s502_s20, 128  ;;  %p940_p13 = scmp.lt.s32.totalorder %s502_s20, %s502_s20 }
  0x5e   :  { %723 = vmatpush3.bf16.msra.mxu0 %v722_v5  ;;  %v740_v14 = vpack.c.bf16 %v198_v11, %v197_v10  ;;  %v104_v16 = vld [vmem:[#allocation5 + $0x30] sm:$0xff]  ;;  %v105_v17 = vld [vmem:[#allocation5 + $0x38] sm:$0xff]  ;;  %v743_v18 = vpack.c.bf16 %v200_v13, %v199_v12  ;;  %v201_v19 = vld [vmem:[#allocation7 + $0x20] sm:$0xff]  ;;  %p936_p12 = scmp.ne.s32.totalorder %s502_s20, %s935_s21  ;;  %p941_p0 = scmp.lt.s32.totalorder %s935_s21, %s935_s21 }
  0x5f   :  { %724 = vmatprep.subr.bf16.mxu0 %v996_v0  ;;  %v202_v20 = vld [vmem:[#allocation7 + $0x28] sm:$0xff]  ;;  %v731_v21 = vpack.c.bf16 %v105_v17, %v104_v16  ;;  %v106_v22 = vld [vmem:[#allocation5 + $0x40] sm:$0xff]  ;;  %v107_v23 = vld [vmem:[#allocation5 + $0x48] sm:$0xff] }
  0x60   :  { %741 = vmatpush3.bf16.msra.mxu1 %v740_v14  ;;  %v746_v24 = vpack.c.bf16 %v202_v20, %v201_v19  ;;  %v203_v25 = vld [vmem:[#allocation7 + $0x30] sm:$0xff]  ;;  %v204_v26 = vld [vmem:[#allocation7 + $0x38] sm:$0xff]  ;;  %v734_v27 = vpack.c.bf16 %v107_v23, %v106_v22  ;;  %v108_v28 = vld [vmem:[#allocation5 + $0x50] sm:$0xff]  ;;  %p942_p1 = por %p941_p0, %p940_p13 }
  0x61   :  { %742 = vmatprep.subr.bf16.mxu1 %v996_v0  ;;  %v109_v29 = vld [vmem:[#allocation5 + $0x58] sm:$0xff]  ;;  %v749_v30 = vpack.c.bf16 %v204_v26, %v203_v25  ;;  %v205_v31 = vld [vmem:[#allocation7 + $0x40] sm:$0xff]  ;;  %v206_v32 = vld [vmem:[#allocation7 + $0x48] sm:$0xff] }
  0x62   :  { %726 = vmatpush3.bf16.msra.mxu0 %v725_v7  ;;  %v737_v33 = vpack.c.bf16 %v109_v29, %v108_v28  ;;  %v752_v34 = vpack.c.bf16 %v206_v32, %v205_v31  ;;  %v207_v35 = vld [vmem:[#allocation7 + $0x50] sm:$0xff]  ;;  %v208_v36 = vld [vmem:[#allocation7 + $0x58] sm:$0xff]  ;;  %v209_v40 = vld [vmem:[#allocation7 + $0x60] sm:$0xff]  ;;  %p943_p2 = pnand %p942_p1, %p936_p12 }
  0x63   :  { %727 = vmatprep.subr.bf16.mxu0 %v996_v0  ;;  %v110_v37 = vld [vmem:[#allocation5 + $0x60] sm:$0xf]  ;;  %v755_v38 = vpack.c.bf16 %v208_v36, %v207_v35  ;;  %v97_v39 = vld [vmem:[#allocation2] sm:$0xff]  ;;  %v210_v41 = vld [vmem:[#allocation7 + $0x68] sm:$0xff] }
  0x64   :  { %744 = vmatpush3.bf16.msra.mxu1 %v743_v18  ;;  %v758_v42 = vpack.c.bf16 %v210_v41, %v209_v40  ;;  %v211_v43 = vld [vmem:[#allocation7 + $0x70] sm:$0xff]  ;;  %v212_v44 = vld [vmem:[#allocation7 + $0x78] sm:$0xff]  ;;  %v291_v46 = vld [vmem:[#allocation8] sm:$0xff] }
  0x65   :  { %745 = vmatprep.subr.bf16.mxu1 %v996_v0  ;;  %v761_v45 = vpack.c.bf16 %v212_v44, %v211_v43  ;;  %v292_v47 = vld [vmem:[#allocation8 + $0x8] sm:$0xff]  ;;  %v293_v48 = vld [vmem:[#allocation8 + $0x10] sm:$0xff]  ;;  %v294_v50 = vld [vmem:[#allocation8 + $0x18] sm:$0xff] }
  0x66   :  { %729 = vmatpush3.bf16.msra.mxu0 %v728_v15  ;;  %v764_v49 = vpack.c.bf16 %v292_v47, %v291_v46  ;;  %v767_v51 = vpack.c.bf16 %v294_v50, %v293_v48  ;;  %v295_v52 = vld [vmem:[#allocation8 + $0x20] sm:$0xff]  ;;  %v296_v53 = vld [vmem:[#allocation8 + $0x28] sm:$0xff]  ;;  %v297_v55 = vld [vmem:[#allocation8 + $0x30] sm:$0xff] }
  0x67   :  { %730 = vmatprep.subr.bf16.mxu0 %v996_v0  ;;  %v770_v54 = vpack.c.bf16 %v296_v53, %v295_v52  ;;  %v298_v56 = vld [vmem:[#allocation8 + $0x38] sm:$0xff]  ;;  %v299_v58 = vld [vmem:[#allocation8 + $0x40] sm:$0xff]  ;;  %v300_v59 = vld [vmem:[#allocation8 + $0x48] sm:$0xff] }
  0x68   :  { %747 = vmatpush3.bf16.msra.mxu1 %v746_v24  ;;  %v773_v57 = vpack.c.bf16 %v298_v56, %v297_v55  ;;  %v776_v60 = vpack.c.bf16 %v300_v59, %v299_v58  ;;  %v301_v61 = vld [vmem:[#allocation8 + $0x50] sm:$0xff]  ;;  %v302_v62 = vld [vmem:[#allocation8 + $0x58] sm:$0xff]  ;;  %v303_v8 = vld [vmem:[#allocation8 + $0x60] sm:$0xff] }
  0x69   :  { %748 = vmatprep.subr.bf16.mxu1 %v996_v0  ;;  %v779_v63 = vpack.c.bf16 %v302_v62, %v301_v61  ;;  %v516_v2 = vld [vmem:[%s1193_s5] ss:$0 sm:$0xff]  ;;  %v304_v9 = vld [vmem:[#allocation8 + $0x68] sm:$0xff]  ;;  %v306_v12 = vld [vmem:[#allocation8 + $0x78] sm:$0xff] }
  0x6a   :  { %732 = vmatpush3.bf16.msra.mxu0 %v731_v21  ;;  %v782_v10 = vpack.c.bf16 %v304_v9, %v303_v8  ;;  %v305_v11 = vld [vmem:[#allocation8 + $0x70] sm:$0xff]  ;;  %v393_v20 = vld [vmem:[#allocation10 + $0x8] sm:$0xff]  ;;  %v395_v23 = vld [vmem:[#allocation10 + $0x18] sm:$0xff] }
  0x6b   :  { %733 = vmatprep.subr.bf16.mxu0 %v996_v0  ;;  %v785_v13 = vpack.c.bf16 %v306_v12, %v305_v11  ;;  %v519_v14 = vld [vmem:[%s1193_s5 + $0x1] ss:$0 sm:$0xff]  ;;  %v396_v25 = vld [vmem:[#allocation10 + $0x20] sm:$0xff]  ;;  %v397_v26 = vld [vmem:[#allocation10 + $0x28] sm:$0xff] }
  0x6c   :  { %750 = vmatpush3.bf16.msra.mxu1 %v749_v30  ;;  %v394_v21 = vld [vmem:[#allocation10 + $0x10] sm:$0xff]  ;;  %v399_v29 = vld [vmem:[#allocation10 + $0x38] sm:$0xff]  ;;  %v404_v44 = vld [vmem:[#allocation10 + $0x60] sm:$0xff] }
  0x6d   :  { %751 = vmatprep.subr.bf16.mxu1 %v996_v0  ;;  %v791_v24 = vpack.c.bf16 %v395_v23, %v394_v21  ;;  %v398_v28 = vld [vmem:[#allocation10 + $0x30] sm:$0xff]  ;;  %v407_v48 = vld [vmem:[#allocation10 + $0x78] sm:$0xff] }
  0x6e   :  { %735 = vmatpush3.bf16.msra.mxu0 %v734_v27  ;;  %v794_v27 = vpack.c.bf16 %v397_v26, %v396_v25  ;;  %v797_v30 = vpack.c.bf16 %v399_v29, %v398_v28  ;;  %v520_v31 = vld [vmem:[%s1193_s5 + $0x2] ss:$0 sm:$0xff] }
  0x6f   :  { %736 = vmatprep.subr.bf16.mxu0 %v996_v0  ;;  %v402_v41 = vld [vmem:[#allocation10 + $0x50] sm:$0xff] }
  0x70   :  { %753 = vmatpush3.bf16.msra.mxu1 %v752_v34  ;;  %v406_v47 = vld [vmem:[#allocation10 + $0x70] sm:$0xff] }
  0x71   :  { %754 = vmatprep.subr.bf16.mxu1 %v996_v0 }
  0x72   :  { %738 = vmatpush3.bf16.msra.mxu0 %v737_v33 }
  0x73   :  { %611 = vmatprep.subr.mxu0 %v998_v1 }
  0x74   :  { %756 = vmatpush3.bf16.msra.mxu1 %v755_v38  ;;  %v400_v38 = vld [vmem:[#allocation10 + $0x40] sm:$0xff] }
  0x75   :  { %757 = vmatprep.subr.bf16.mxu1 %v996_v0 }
  0x76   :  { %612 = vmatpush3.msk.msra.mxu0 %vm121_vm1, %v110_v37 }
  0x77   :  { %614 = vmatmul.mubr.msk.f32.vlgmr.msra.gmra.mrb[0].mxu0 %vm117_vm2, %v97_v39  ;;  %763 = vmatprep.subr.bf16.mxu0 %v996_v0  ;;  %v401_v39 = vld [vmem:[#allocation10 + $0x48] sm:$0xff] }
  0x78   :  { %683 = vmatprep.mubr.msk.f32.mxu0 %vm997_vm0, %v998_v1  ;;  %759 = vmatpush3.bf16.msra.mxu1 %v758_v42  ;;  %v800_v40 = vpack.c.bf16 %v401_v39, %v400_v38  ;;  %v403_v42 = vld [vmem:[#allocation10 + $0x58] sm:$0xff] }
  0x79   :  { %760 = vmatprep.subr.bf16.mxu1 %v996_v0  ;;  %765 = vmatpush3.bf16.msra.mxu0 %v764_v49  ;;  %v803_v43 = vpack.c.bf16 %v403_v42, %v402_v41  ;;  %v809_v49 = vpack.c.bf16 %v407_v48, %v406_v47 }
  0x7a   :  { %766 = vmatprep.subr.bf16.mxu0 %v996_v0 }
  0x7c   :  { %762 = vmatpush3.bf16.msra.mxu1 %v761_v45  ;;  %v405_v45 = vld [vmem:[#allocation10 + $0x68] sm:$0xff] }
  0x7d   :  { %787 = vmatprep.subr.bf16.mxu1 %v996_v0  ;;  %768 = vmatpush3.bf16.msra.mxu0 %v767_v51  ;;  %v806_v46 = vpack.c.bf16 %v405_v45, %v404_v44 }
  0x7e   :  { %769 = vmatprep.subr.bf16.mxu0 %v996_v0 }
  0x81   :  { %771 = vmatpush3.bf16.msra.mxu0 %v770_v54 }
  0x82   :  { %772 = vmatprep.subr.bf16.mxu0 %v996_v0 }
  0x85   :  { %774 = vmatpush3.bf16.msra.mxu0 %v773_v57 }
  0x86   :  { %775 = vmatprep.subr.bf16.mxu0 %v996_v0 }
  0x89   :  { %777 = vmatpush3.bf16.msra.mxu0 %v776_v60 }
  0x8a   :  { %778 = vmatprep.subr.bf16.mxu0 %v996_v0 }
  0x8d   :  { %780 = vmatpush3.bf16.msra.mxu0 %v779_v63 }
  0x8e   :  { %781 = vmatprep.subr.bf16.mxu0 %v996_v0 }
  0x91   :  { %783 = vmatpush3.bf16.msra.mxu0 %v782_v10 }
  0x92   :  { %784 = vmatprep.subr.bf16.mxu0 %v996_v0 }
  0x95   :  { %786 = vmatpush3.bf16.msra.mxu0 %v785_v13 }
 0x14a   :  { %v191_v3 = vpop.f32.mrb[0].mxu0 }
 0x14b   :  { %v192_v4 = vadd.f32 %v516_v2, %v191_v3  ;;  %v615_v5 = vpop.f32.mrb[1].mxu0 }
 0x14d   :  { %v195_v6 = vmul.f32 0.01, %v192_v4 }
 0x14f   :  { %v196_v7 = vmax.f32 %v192_v4, %v195_v6 }
 0x151   :  { %649 = vmatmul.mubr.f32.vlgmr.msra.gmra.mrb[0].mxu1 %v196_v7 }
 0x152   :  { %718 = vmatprep.mubr.msk.f32.mxu1 %vm997_vm0, %v998_v1  ;;  %v392_v1 = vld [vmem:[#allocation10] sm:$0xff] }
 0x153   :  { %v788_v22 = vpack.c.bf16 %v393_v20, %v392_v1 }
 0x155   :  { %789 = vmatpush3.bf16.msra.mxu1 %v788_v22 }
 0x156   :  { %790 = vmatprep.subr.bf16.mxu1 %v996_v0 }
 0x159   :  { %792 = vmatpush3.bf16.msra.mxu1 %v791_v24 }
 0x15a   :  { %793 = vmatprep.subr.bf16.mxu1 %v996_v0 }
 0x15d   :  { %795 = vmatpush3.bf16.msra.mxu1 %v794_v27 }
 0x15e   :  { %796 = vmatprep.subr.bf16.mxu1 %v996_v0 }
 0x161   :  { %798 = vmatpush3.bf16.msra.mxu1 %v797_v30 }
 0x162   :  { %799 = vmatprep.subr.bf16.mxu1 %v996_v0 }
 0x165   :  { %801 = vmatpush3.bf16.msra.mxu1 %v800_v40 }
 0x166   :  { %802 = vmatprep.subr.bf16.mxu1 %v996_v0 }
 0x169   :  { %804 = vmatpush3.bf16.msra.mxu1 %v803_v43 }
 0x16a   :  { %805 = vmatprep.subr.bf16.mxu1 %v996_v0 }
 0x16d   :  { %807 = vmatpush3.bf16.msra.mxu1 %v806_v46 }
 0x16e   :  { %808 = vmatprep.subr.bf16.mxu1 %v996_v0 }
 0x171   :  { %810 = vmatpush3.bf16.msra.mxu1 %v809_v49 }
 0x224   :  { %v285_v15 = vpop.f32.mrb[0].mxu1 }
 0x225   :  { %v286_v16 = vadd.f32 %v519_v14, %v285_v15  ;;  %v650_v17 = vpop.f32.mrb[1].mxu1 }
 0x227   :  { %v289_v18 = vmul.f32 0.01, %v286_v16 }
 0x229   :  { %v290_v19 = vmax.f32 %v286_v16, %v289_v18 }
 0x22b   :  { %684 = vmatmul.mubr.f32.vlgmr.msra.gmra.mrb[2].mxu0 %v290_v19 }
 0x2fe   :  { %v379_v32 = vpop.f32.mrb[2].mxu0 }
 0x2ff   :  { %v380_v33 = vadd.f32 %v520_v31, %v379_v32  ;;  %v685_v34 = vpop.f32.mrb[3].mxu0 }
 0x301   :  { %v383_v35 = vmul.f32 0.01, %v380_v33 }
 0x303   :  { %v384_v36 = vmax.f32 %v380_v33, %v383_v35 }
 0x305   :  { %v385_v37 = vmul.f32 %v384_v36, %v384_v36 }
 0x307   :  { %386 = vadd.xlane.f32.xlu0 %v385_v37 }
 0x394   :  { %v387_v50 = vpop.xlane.xlu0 %386 }
 0x395   :  { %v388_v51 = vmax.f32 %v387_v50, 1e-24 }
 0x397   :  { %823 = vrsqrt.f32 %v388_v51 }
 0x3a1   :  { %v824_v52 = vpop.eup %823 }
 0x3a2   :  { %v390_v53 = vmul.f32 %v824_v52, %v384_v36 }
 0x3a4   :  { %719 = vmatmul.mubr.f32.vlgmr.msra.gmra.mrb[2].mxu1 %v390_v53  ;;  %391 = vst [vmem:[#allocation12] sm:$0xff] %v390_v53 }
 0x3a5   :  { %946 = shalt.err (!%p943_p2)
}
 0x3a6   :  { %s947_s24 = scalar_lea.hbm %s1195_s7, 128 }
 0x3a7   :  { %p948_p3 = scmp.ne.s32.totalorder %s1195_s7, %s947_s24  ;;  %p951_p4 = scmp.lt.u32.totalorder %s947_s24, %s1195_s7 }
 0x3a9   :  { %p953_p5 = pnand %p951_p4, %p948_p3 }
 0x3ab   :  { %956 = shalt.err (!%p953_p5)
}
 0x3ac   :  { %504 = dma.vmem_to_hbm [thread:$0]  %s502_s20, 128, %s1195_s7, [#allocation13]   ;;  %v521_v0 = vld [vmem:[%s1193_s5 + $0x3] ss:$0 sm:$0xff] }
 0x3ad   :  { %s1000_s30 = smov [#allocation11]  }
 0x3ae   :  { %s491_s8 = sshll.u32 %s1000_s30, 4  ;;  %s492_s8 = int_to_ptr.vmem [resolvable:$true] %s491_s8 }
 0x3af   :  { %s957_s9 = scalar_lea.vmem %s492_s8, 128  ;;  %p962_p7 = scmp.lt.s32.totalorder %s492_s8, %s492_s8 }
 0x3b0   :  { %p958_p6 = scmp.ne.s32.totalorder %s492_s8, %s957_s9  ;;  %p963_p8 = scmp.lt.s32.totalorder %s957_s9, %s957_s9 }
 0x3b2   :  { %p964_p9 = por %p963_p8, %p962_p7 }
 0x3b4   :  { %p965_p10 = pnand %p964_p9, %p958_p6 }
 0x477   :  { %v480_v54 = vpop.f32.mrb[2].mxu1 }
 0x478   :  { %v481_v55 = vadd.f32 %v521_v0, %v480_v54  ;;  %v720_v56 = vpop.f32.mrb[3].mxu1 }
 0x47a   :  { %484 = vst [vmem:[#allocation11] sm:$0xff] %v481_v55 }
 0x47b   :  { %968 = shalt.err (!%p965_p10)
}
 0x47c   :  { %s969_s13 = scalar_lea.hbm %s1194_s6, 128 }
 0x47d   :  { %p970_p11 = scmp.ne.s32.totalorder %s1194_s6, %s969_s13  ;;  %p973_p12 = scmp.lt.u32.totalorder %s969_s13, %s1194_s6 }
 0x47f   :  { %p975_p13 = pnand %p973_p12, %p970_p11 }
 0x481   :  { %978 = shalt.err (!%p975_p13)
}
 0x482   :  { %494 = dma.vmem_to_hbm [thread:$0]  %s492_s8, 128, %s1194_s6, [#allocation4]  }
 0x483   :  { %985 = dma.done.wait [#allocation4], 128  }
 0x484   :  { %986 = vsyncadd [#allocation4], 4294967168 }
 0x485   :  { %987 = dma.done.wait [#allocation13], 128  }
 0x486   :  { %988 = vsyncadd [#allocation13], 4294967168 }
 0x487   :  { %511 = vsyncpa [#allocation3], 1 }
 0x488   :  { %512 = vsyncpa [#allocation6], 1 }
 0x489   :  { %513 = vsyncpa [#allocation9], 1 }
 0x48a   :  { %514 = vsyncpa [#allocation4], 1 }
 0x48b   :  { %515 = vsyncpa [#allocation13], 1 }

</bundles_post_ra>
